<compile_context>
chip_gen: v5e
topology: v5e:2x2
jax: 0.10.0
libtpu: 0.0.40
codegen_flags: <defaults>
</compile_context>

<pallas_src>
import functools
import math

import jax
import jax.numpy as jnp
from jax.experimental import pallas as pl
from jax.experimental.pallas import tpu as pltpu


LANE = 128  # output / packed-vector lane padding (one full vreg lane width)


def _mxu_dot(a, b, use_bf16):
    if use_bf16:
        a = a.astype(jnp.bfloat16)
        b = b.astype(jnp.bfloat16)
    return jnp.dot(a, b, preferred_element_type=jnp.float32)


def actor_kernel(state_ref, w1_ref, w2_ref, w3_ref, vecs_ref, *rest,
                 hidden, max_action, add_noise, bf16_matmul):
    """Fused MLP: Linear -> LayerNorm(normalize only) -> Linear -> ReLU ->
    Linear -> Tanh -> [scale] -> [noise + clamp]."""
    out_ref = rest[-1]
    noise_ref = rest[0] if add_noise else None

    x = state_ref[...]                       # (TB, S) f32
    vecs = vecs_ref[...]                     # (8, LANE) packed small params
    b1 = vecs[0:1, :hidden]                  # (1, H)
    b2 = vecs[1:2, :hidden]                  # (1, H)   -- already beta@w2 + b2
    b3 = vecs[2:3, :]                        # (1, LANE), zero in padded lanes

    # Linear 1 + bias
    h = _mxu_dot(x, w1_ref[...], bf16_matmul) + b1

    # LayerNorm (biased variance, eps=1e-5); affine folded into w2/b2 offline.
    mu = jnp.mean(h, axis=-1, keepdims=True)
    d = h - mu
    var = jnp.mean(d * d, axis=-1, keepdims=True)
    hn = d * jax.lax.rsqrt(var + 1e-5)

    # Linear 2 (LN affine folded in) + ReLU
    h2 = jnp.maximum(_mxu_dot(hn, w2_ref[...], bf16_matmul) + b2, 0.0)

    # Linear 3 (output cols padded to LANE with zeros) + Tanh
    a = jnp.tanh(_mxu_dot(h2, w3_ref[...], bf16_matmul) + b3)

    if max_action != 1.0:                    # static: skipped when == 1.0
        a = a * max_action

    if add_noise:
        a = jnp.clip(a + noise_ref[...], -1.0, 1.0)

    out_ref[...] = a                         # lane-dense (TB, LANE) store


def prepare_actor_params(raw):
    """One-time host-side prep: fold LN affine + bias into Linear-2, pad w3 to
    LANE output columns, pack all bias vectors into a single (8, LANE) array."""
    H = raw["w2"].shape[0]
    A = raw["w3"].shape[1]
    assert H <= LANE and A <= LANE, "packing assumes hidden/action <= 128"

    g = raw["ln_g"].reshape(-1)                       # (H,)
    beta = raw["ln_b"].reshape(1, -1)                 # (1, H)
    w2f = g[:, None] * raw["w2"]                      # fold LN scale into w2
    b2f = beta @ raw["w2"] + raw["b2"]                # fold LN shift into b2

    w3p = jnp.zeros((H, LANE), jnp.float32).at[:, :A].set(raw["w3"])

    vecs = jnp.zeros((8, LANE), jnp.float32)
    vecs = vecs.at[0, :H].set(raw["b1"].reshape(-1))
    vecs = vecs.at[1, :H].set(b2f.reshape(-1))
    vecs = vecs.at[2, :A].set(raw["b3"].reshape(-1))

    return {"w1": raw["w1"].astype(jnp.float32),
            "w2f": w2f.astype(jnp.float32),
            "w3p": w3p, "vecs": vecs, "H": H, "A": A}


def actor_forward(prep, state, *, max_action=1.0, noise=None, bf16_matmul=False):
    """Run the Actor MLP on TPU.

    noise is None  -> deterministic path (forward(state, mean=True)).
    noise (B, A)   -> stochastic path + clamp(-1, 1).
    """
    B, S = state.shape
    H, A = prep["H"], prep["A"]
    add_noise = noise is not None

    # Batch tiling: TB multiple of 8, capped at 512 rows (fits every chip's
    # scoped VMEM with margin); pad batch up to a whole number of tiles.
    B8 = ((B + 7) // 8) * 8
    TB = min(512, B8)
    nblocks = -(-B8 // TB)
    B_pad = nblocks * TB

    state_p = jnp.pad(state.astype(jnp.float32), ((0, B_pad - B), (0, 0)))

    args = [state_p, prep["w1"], prep["w2f"], prep["w3p"], prep["vecs"]]
    in_specs = [
        pl.BlockSpec((TB, S), lambda i: (i, 0)),       # state: tiled over batch
        pl.BlockSpec((S, H), lambda i: (0, 0)),        # weights: VMEM-resident
        pl.BlockSpec((H, H), lambda i: (0, 0)),
        pl.BlockSpec((H, LANE), lambda i: (0, 0)),
        pl.BlockSpec((8, LANE), lambda i: (0, 0)),     # packed bias vectors
    ]
    if add_noise:
        noise_p = jnp.zeros((B_pad, LANE), jnp.float32).at[:B, :A].set(
            noise.astype(jnp.float32))
        args.append(noise_p)
        in_specs.append(pl.BlockSpec((TB, LANE), lambda i: (i, 0)))

    kernel = functools.partial(actor_kernel, hidden=H,
                               max_action=float(max_action),
                               add_noise=add_noise, bf16_matmul=bf16_matmul)

    out = pl.pallas_call(
        kernel,
        out_shape=jax.ShapeDtypeStruct((B_pad, LANE), jnp.float32),
        grid=(nblocks,),
        in_specs=in_specs,
        out_specs=pl.BlockSpec((TB, LANE), lambda i: (i, 0)),
        compiler_params=pltpu.CompilerParams(
            dimension_semantics=("parallel",)),       # shard batch over TCs (v7x)
    )(*args)

    return out[:B, :A]


class ActorState:
    """Mirrors the stateful eps / x_coor bookkeeping of the PyTorch Actor."""

    def __init__(self, max_action=1.0):
        self.max_action = float(max_action)
        self.eps = 3.0
        self.x_coor = 0.0

    def accuracy(self):
        if self.eps > 0.001:
            self.eps = 3.0 * self.max_action * math.exp(-self.x_coor) + 0.03
            self.x_coor += 3e-05
            return True
        return False


def init_actor_params(key, state_dim, hidden_dim, action_dim):
    ks = jax.random.split(key, 5)

    def lin(k, fan_in, fan_out):
        bound = 1.0 / math.sqrt(fan_in)
        kw, kb = jax.random.split(k)
        w = jax.random.uniform(kw, (fan_in, fan_out), jnp.float32, -bound, bound)
        b = jax.random.uniform(kb, (1, fan_out), jnp.float32, -bound, bound)
        return w, b

    w1, b1 = lin(ks[0], state_dim, hidden_dim)
    w2, b2 = lin(ks[1], hidden_dim, hidden_dim)
    w3, b3 = lin(ks[2], hidden_dim, action_dim)
    # Non-trivial LN affine so the offline folding path is actually exercised.
    ln_g = 1.0 + 0.1 * jax.random.normal(ks[3], (1, hidden_dim), jnp.float32)
    ln_b = 0.1 * jax.random.normal(ks[4], (1, hidden_dim), jnp.float32)
    return {"w1": w1, "b1": b1, "ln_g": ln_g, "ln_b": ln_b,
            "w2": w2, "b2": b2, "w3": w3, "b3": b3}


def reference_forward(raw, state, max_action, noise=None):
    """Pure-JAX reference using the *unfolded* params (matches the torch net)."""
    h = state @ raw["w1"] + raw["b1"]
    mu = jnp.mean(h, axis=-1, keepdims=True)
    var = jnp.mean((h - mu) ** 2, axis=-1, keepdims=True)
    h = (h - mu) / jnp.sqrt(var + 1e-5) * raw["ln_g"] + raw["ln_b"]
    h = jnp.maximum(h @ raw["w2"] + raw["b2"], 0.0)
    x = max_action * jnp.tanh(h @ raw["w3"] + raw["b3"])
    if noise is None:
        return x
    return jnp.clip(x + noise, -1.0, 1.0)


if __name__ == "__main__":
    # Small shapes consistent with the module (Actor default hidden_dim=32).
    batch, state_dim, hidden_dim, action_dim = 2, 16, 32, 4
    max_action = 1.0

    key = jax.random.PRNGKey(0)
    kp, ks, kn = jax.random.split(key, 3)

    raw = init_actor_params(kp, state_dim, hidden_dim, action_dim)
    prep = prepare_actor_params(raw)
    state = jax.random.normal(ks, (batch, state_dim), jnp.float32)

    # --- deterministic path (forward(state, mean=True)) ---
    out_mean = jax.block_until_ready(
        actor_forward(prep, state, max_action=max_action))
    ref_mean = reference_forward(raw, state, max_action)
    assert out_mean.shape == (batch, action_dim)
    assert jnp.allclose(out_mean, ref_mean, atol=1e-4, rtol=1e-4)

    # --- deterministic path with a non-unit max_action (exercises the scale) ---
    out_scaled = jax.block_until_ready(
        actor_forward(prep, state, max_action=0.5))
    ref_scaled = reference_forward(raw, state, 0.5)
    assert jnp.allclose(out_scaled, ref_scaled, atol=1e-4, rtol=1e-4)

    # --- stochastic path (forward(state)); eps bookkeeping is host-side ---
    # TODO(synk): noise could be drawn in-kernel via pltpu.prng_seed +
    # pltpu.stateful_normal (seed in SMEM) to drop this HBM round trip entirely.
    actor_state = ActorState(max_action)
    took_noise = actor_state.accuracy()          # updates eps like the torch code
    noise = (actor_state.eps *
             jax.random.normal(kn, (batch, action_dim), jnp.float32)
             if took_noise else None)
    out_noisy = jax.block_until_ready(
        actor_forward(prep, state, max_action=max_action, noise=noise))
    ref_noisy = reference_forward(raw, state, max_action, noise=noise)
    assert jnp.allclose(out_noisy, ref_noisy, atol=1e-4, rtol=1e-4)
    assert bool(jnp.all(out_noisy <= 1.0)) and bool(jnp.all(out_noisy >= -1.0))

    print("KERNEL_OK")
</pallas_src>

<mosaic_0001>
module attributes {stable_mosaic.version = 11 : i64} {
  func.func @actor_kernel(%arg0: i32, %arg1: memref<8x16xf32, #tpu.memory_space<vmem>>, %arg2: memref<16x32xf32, #tpu.memory_space<vmem>>, %arg3: memref<32x32xf32, #tpu.memory_space<vmem>>, %arg4: memref<32x128xf32, #tpu.memory_space<vmem>>, %arg5: memref<8x128xf32, #tpu.memory_space<vmem>>, %arg6: memref<8x128xf32, #tpu.memory_space<vmem>>) attributes {dimension_semantics = [#tpu.dimension_semantics<parallel>], iteration_bounds = array<i64: 1>, scalar_prefetch = 0 : i64, scratch_operands = 0 : i64, tpu.core_type = #tpu.core_type<tc>, window_params = [{transform_indices = @transform_0, window_bounds = array<i64: 8, 16>}, {pipeline_mode = #tpu.pipeline_mode<synchronous>, transform_indices = @transform_1, window_bounds = array<i64: 16, 32>}, {pipeline_mode = #tpu.pipeline_mode<synchronous>, transform_indices = @transform_2, window_bounds = array<i64: 32, 32>}, {pipeline_mode = #tpu.pipeline_mode<synchronous>, transform_indices = @transform_3, window_bounds = array<i64: 32, 128>}, {pipeline_mode = #tpu.pipeline_mode<synchronous>, transform_indices = @transform_4, window_bounds = array<i64: 8, 128>}, {transform_indices = @transform_5, window_bounds = array<i64: 8, 128>}]} {
    %c0 = arith.constant 0 : index
    %c0_0 = arith.constant 0 : index
    %0 = vector.load %arg1[%c0, %c0_0] : memref<8x16xf32, #tpu.memory_space<vmem>>, vector<8x16xf32>
    %c0_1 = arith.constant 0 : index
    %c0_2 = arith.constant 0 : index
    %1 = vector.load %arg5[%c0_1, %c0_2] : memref<8x128xf32, #tpu.memory_space<vmem>>, vector<8x128xf32>
    %2 = vector.extract_strided_slice %1 {offsets = [0, 0], sizes = [1, 32], strides = [1, 1]} : vector<8x128xf32> to vector<1x32xf32>
    %3 = vector.extract_strided_slice %1 {offsets = [1, 0], sizes = [1, 32], strides = [1, 1]} : vector<8x128xf32> to vector<1x32xf32>
    %4 = vector.extract_strided_slice %1 {offsets = [2, 0], sizes = [1, 128], strides = [1, 1]} : vector<8x128xf32> to vector<1x128xf32>
    %c0_3 = arith.constant 0 : index
    %c0_4 = arith.constant 0 : index
    %5 = vector.load %arg2[%c0_3, %c0_4] : memref<16x32xf32, #tpu.memory_space<vmem>>, vector<16x32xf32>
    %cst = arith.constant dense<0.000000e+00> : vector<8x32xf32>
    %6 = tpu.matmul %0, %5, %cst {dimension_numbers = #tpu.dot_dimension_numbers<[1], [0], [0], [1], [0, 0, 1, 1], [], []>} : vector<8x16xf32>, vector<16x32xf32>, vector<8x32xf32> -> vector<8x32xf32>
    %7 = vector.broadcast %2 : vector<1x32xf32> to vector<8x32xf32>
    %8 = arith.addf %6, %7 : vector<8x32xf32>
    %cst_5 = arith.constant dense<0.000000e+00> : vector<8xf32>
    %9 = vector.multi_reduction <add>, %8, %cst_5 [1] : vector<8x32xf32> to vector<8xf32>
    %10 = vector.shape_cast %9 : vector<8xf32> to vector<8x1xf32>
    %cst_6 = arith.constant 3.200000e+01 : f32
    %11 = vector.broadcast %cst_6 : f32 to vector<8x1xf32>
    %12 = arith.divf %10, %11 : vector<8x1xf32>
    %13 = vector.broadcast %12 : vector<8x1xf32> to vector<8x32xf32>
    %14 = arith.subf %8, %13 : vector<8x32xf32>
    %15 = arith.mulf %14, %14 : vector<8x32xf32>
    %cst_7 = arith.constant dense<0.000000e+00> : vector<8xf32>
    %16 = vector.multi_reduction <add>, %15, %cst_7 [1] : vector<8x32xf32> to vector<8xf32>
    %17 = vector.shape_cast %16 : vector<8xf32> to vector<8x1xf32>
    %cst_8 = arith.constant 3.200000e+01 : f32
    %18 = vector.broadcast %cst_8 : f32 to vector<8x1xf32>
    %19 = arith.divf %17, %18 : vector<8x1xf32>
    %cst_9 = arith.constant 9.99999974E-6 : f32
    %20 = vector.broadcast %cst_9 : f32 to vector<8x1xf32>
    %21 = arith.addf %19, %20 : vector<8x1xf32>
    %22 = math.rsqrt %21 : vector<8x1xf32>
    %23 = vector.broadcast %22 : vector<8x1xf32> to vector<8x32xf32>
    %24 = arith.mulf %14, %23 : vector<8x32xf32>
    %c0_10 = arith.constant 0 : index
    %c0_11 = arith.constant 0 : index
    %25 = vector.load %arg3[%c0_10, %c0_11] : memref<32x32xf32, #tpu.memory_space<vmem>>, vector<32x32xf32>
    %cst_12 = arith.constant dense<0.000000e+00> : vector<8x32xf32>
    %26 = tpu.matmul %24, %25, %cst_12 {dimension_numbers = #tpu.dot_dimension_numbers<[1], [0], [0], [1], [0, 0, 1, 1], [], []>} : vector<8x32xf32>, vector<32x32xf32>, vector<8x32xf32> -> vector<8x32xf32>
    %27 = vector.broadcast %3 : vector<1x32xf32> to vector<8x32xf32>
    %28 = arith.addf %26, %27 : vector<8x32xf32>
    %cst_13 = arith.constant 0.000000e+00 : f32
    %29 = vector.broadcast %cst_13 : f32 to vector<8x32xf32>
    %30 = arith.maximumf %28, %29 : vector<8x32xf32>
    %c0_14 = arith.constant 0 : index
    %c0_15 = arith.constant 0 : index
    %31 = vector.load %arg4[%c0_14, %c0_15] : memref<32x128xf32, #tpu.memory_space<vmem>>, vector<32x128xf32>
    %cst_16 = arith.constant dense<0.000000e+00> : vector<8x128xf32>
    %32 = tpu.matmul %30, %31, %cst_16 {dimension_numbers = #tpu.dot_dimension_numbers<[1], [0], [0], [1], [0, 0, 1, 1], [], []>} : vector<8x32xf32>, vector<32x128xf32>, vector<8x128xf32> -> vector<8x128xf32>
    %33 = vector.broadcast %4 : vector<1x128xf32> to vector<8x128xf32>
    %34 = arith.addf %32, %33 : vector<8x128xf32>
    %35 = math.tanh %34 : vector<8x128xf32>
    %c0_17 = arith.constant 0 : index
    %c0_18 = arith.constant 0 : index
    %36 = vector.load %arg6[%c0_17, %c0_18] : memref<8x128xf32, #tpu.memory_space<vmem>>, vector<8x128xf32>
    tpu.vector_store %arg6[%c0_17, %c0_18], %35 {strides = array<i32>} : memref<8x128xf32, #tpu.memory_space<vmem>>, vector<8x128xf32>,
    return
  }
  func.func @transform_0(%arg0: i32) -> (i32, i32) {
    %c0_i32 = arith.constant 0 : i32
    %c0_i32_0 = arith.constant 0 : i32
    return %arg0, %c0_i32 : i32, i32
  }
  func.func @transform_1(%arg0: i32) -> (i32, i32) {
    %c0_i32 = arith.constant 0 : i32
    %c0_i32_0 = arith.constant 0 : i32
    %c0_i32_1 = arith.constant 0 : i32
    return %c0_i32, %c0_i32_0 : i32, i32
  }
  func.func @transform_2(%arg0: i32) -> (i32, i32) {
    %c0_i32 = arith.constant 0 : i32
    %c0_i32_0 = arith.constant 0 : i32
    %c0_i32_1 = arith.constant 0 : i32
    return %c0_i32, %c0_i32_0 : i32, i32
  }
  func.func @transform_3(%arg0: i32) -> (i32, i32) {
    %c0_i32 = arith.constant 0 : i32
    %c0_i32_0 = arith.constant 0 : i32
    %c0_i32_1 = arith.constant 0 : i32
    return %c0_i32, %c0_i32_0 : i32, i32
  }
  func.func @transform_4(%arg0: i32) -> (i32, i32) {
    %c0_i32 = arith.constant 0 : i32
    %c0_i32_0 = arith.constant 0 : i32
    %c0_i32_1 = arith.constant 0 : i32
    return %c0_i32, %c0_i32_0 : i32, i32
  }
  func.func @transform_5(%arg0: i32) -> (i32, i32) {
    %c0_i32 = arith.constant 0 : i32
    %c0_i32_0 = arith.constant 0 : i32
    return %arg0, %c0_i32 : i32, i32
  }
}

</mosaic_0001>

<bundles_post_ra>
// kernel: tpu_custom_call.1
= control target key start
LH: loop header
LB: loop body
LE: loop exit
PB: predicated region body
PF: predicated region fallthrough
CT: control target
= control target key end

     0   :  { %10 = vsyncpa [#allocation3], 0  ;;  %s463_s0 = inlined_call_operand.hbm [shape: f32[8,16], index: 0, kind: input, shape index: {}]   ;;  %s464_s1 = inlined_call_operand.hbm [shape: f32[16,32], index: 1, kind: input, shape index: {}]   ;;  %s465_s2 = inlined_call_operand.hbm [shape: f32[32,32], index: 2, kind: input, shape index: {}]   ;;  %s466_s3 = inlined_call_operand.hbm [shape: f32[32,128], index: 3, kind: input, shape index: {}]   ;;  %s467_s4 = inlined_call_operand.hbm [shape: f32[8,128], index: 4, kind: input, shape index: {}]   ;;  %s468_s5 = inlined_call_operand.hbm [shape: f32[8,128], index: 5, kind: output, shape index: {}]  }
   0x1   :  { %11 = vsyncpa [#allocation6], 0 }
   0x2   :  { %12 = vsyncpa [#allocation9], 0  ;;  %s29_s20 = sshll.u32 %s464_s1, 4  ;;  %s30_s20 = int_to_ptr.hbm [resolvable:$true] %s29_s20 }
   0x3   :  { %13 = vsyncpa [#allocation4], 0  ;;  %s402_s21 = smov [#allocation5]   ;;  %s55_s25 = sshll.u32 %s466_s3, 4  ;;  %s56_s25 = int_to_ptr.hbm [resolvable:$true] %s55_s25 }
   0x4   :  { %s31_s22 = sshll.u32 %s402_s21, 4  ;;  %s403_s26 = smov 128   ;;  %s32_s22 = int_to_ptr.vmem [resolvable:$true] %s31_s22 }
   0x5   :  { %s404_s27 = smov 8   ;;  %s405_s28 = smov [#allocation8]  }
   0x6   :  { %37 = dma.hbm_to_vmem [thread:$0]  %s30_s20, 256, %s32_s22, [#allocation6], %s403_s26, %s403_s26, %s404_s27  }
   0x7   :  { %s57_s29 = sshll.u32 %s405_s28, 4  ;;  %s19_s7 = sshll.u32 %s463_s0, 4  ;;  %s58_s29 = int_to_ptr.vmem [resolvable:$true] %s57_s29  ;;  %s20_s7 = int_to_ptr.hbm [resolvable:$true] %s19_s7 }
   0x8   :  { %63 = dma.hbm_to_vmem [thread:$0]  %s56_s25, 512, %s58_s29, [#allocation9], %s403_s26, %s403_s26, %s404_s27  }
   0x9   :  { %s42_s9 = sshll.u32 %s465_s2, 4  ;;  %s406_s10 = smov [#allocation2]   ;;  %s43_s9 = int_to_ptr.hbm [resolvable:$true] %s42_s9 }
   0xa   :  { %s21_s11 = sshll.u32 %s406_s10, 4  ;;  %s407_s3 = smov [#allocation7]   ;;  %s22_s11 = int_to_ptr.vmem [resolvable:$true] %s21_s11 }
   0xb   :  { %24 = dma.hbm_to_vmem [thread:$0]  %s20_s7, 128, %s22_s11, [#allocation3]  }
   0xc   :  { %s44_s12 = sshll.u32 %s407_s3, 4  ;;  %s69_s15 = sshll.u32 %s467_s4, 4  ;;  %s45_s12 = int_to_ptr.vmem [resolvable:$true] %s44_s12  ;;  %s70_s15 = int_to_ptr.hbm [resolvable:$true] %s69_s15 }
   0xd   :  { %50 = dma.hbm_to_vmem [thread:$0]  %s43_s9, 512, %s45_s12, [#allocation6], %s403_s26, %s403_s26, %s404_s27  }
   0xe   :  { %s408_s0 = smov [#allocation10]  }
   0xf   :  { %s71_s16 = sshll.u32 %s408_s0, 4  ;;  %s72_s16 = int_to_ptr.vmem [resolvable:$true] %s71_s16 }
  0x10   :  { %74 = dma.hbm_to_vmem [thread:$0]  %s70_s15, 128, %s72_s16, [#allocation9]  }
  0x11   :  { %394 = dma.done.wait [#allocation3], 128  }
  0x12   :  { %395 = vsyncadd [#allocation3], 4294967168 }
  0x13   :  { %396 = dma.done.wait [#allocation6], 768  }
  0x14   :  { %397 = vsyncadd [#allocation6], 4294966528 }
  0x15   :  { %398 = dma.done.wait [#allocation9], 640  }
  0x16   :  { %399 = vsyncadd [#allocation9], 4294966656  ;;  %v98_v0 = vld [vmem:[#allocation5 + $0x8] sm:$0xff]  ;;  %v97_v1 = vld [vmem:[#allocation5] sm:$0xff]  ;;  %vm100_vm0 = vcmask 130048   ;;  %vm124_vm1 = vcmask 261120  }
  0x17   :  { %118 = vmatpush.msra.mxu0 %v98_v0  ;;  %v95_v2 = vld [vmem:[#allocation2] sm:$0xff]  ;;  %v96_v3 = vld [vmem:[#allocation10] sm:$0xff]  ;;  %v409_v8 = vmov 32.0   ;;  %v157_v20 = vld [vmem:[#allocation7 + $0x18] sm:$0xff]  ;;  %s410_s2 = smov [#allocation11]   ;;  %s220_s19 = sshll.u32 %s468_s5, 4  ;;  %s221_s19 = int_to_ptr.hbm [resolvable:$true] %s220_s19 }
  0x18   :  { %v99_v4 = vperm.slane %v96_v3, 0  ;;  %244 = vrcp.f32 %v409_v8  ;;  %174 = vmatpush.msra.mxu1 %v157_v20  ;;  %v156_v21 = vld [vmem:[#allocation7 + $0x10] sm:$0xff]  ;;  %v155_v22 = vld [vmem:[#allocation7 + $0x8] sm:$0xff]  ;;  %v154_v23 = vld [vmem:[#allocation7] sm:$0xff]  ;;  %v158_v39 = vperm.slane %v96_v3, 1  ;;  %v187_v43 = vperm.slane %v96_v3, 2 }
  0x19   :  { %119 = vmatpush.msra.mxu0 %v97_v1  ;;  %v186_v24 = vld [vmem:[#allocation8 + $0x18] sm:$0xff]  ;;  %v185_v36 = vld [vmem:[#allocation8 + $0x10] sm:$0xff]  ;;  %v184_v37 = vld [vmem:[#allocation8 + $0x8] sm:$0xff]  ;;  %s218_s4 = sshll.u32 %s410_s2, 4  ;;  %s219_s4 = int_to_ptr.vmem [resolvable:$true] %s218_s4 }
  0x1a   :  { %232 = vmatmul.msk.f32.vlgmr.msra.gmra.mxu0 %vm100_vm0, %v95_v2  ;;  %175 = vmatpush.msra.mxu1 %v156_v21  ;;  %v183_v38 = vld [vmem:[#allocation8] sm:$0xff] }
  0x1b   :  { %203 = vmatpush.msra.mxu2 %v186_v24 }
  0x1c   :  { %176 = vmatpush.msra.mxu1 %v155_v22 }
  0x1d   :  { %204 = vmatpush.msra.mxu2 %v185_v36 }
  0x1e   :  { %v245_v9 = vpop.eup %244  ;;  %177 = vmatpush.msra.mxu1 %v154_v23 }
  0x1f   :  { %v129_v10 = vmul.f32 32.0, %v245_v9  ;;  %vm133_vm2 = vweird.f32 %v245_v9  ;;  %205 = vmatpush.msra.mxu2 %v184_v37 }
  0x21   :  { %v130_v11 = vsub.f32 1.0, %v129_v10  ;;  %206 = vmatpush.msra.mxu2 %v183_v38 }
  0x23   :  { %v131_v12 = vmul.f32 %v245_v9, %v130_v11 }
  0x25   :  { %v132_v13 = vadd.f32 %v245_v9, %v131_v12 }
  0x27   :  { %v134_v14 = vsel %vm133_vm2, %v245_v9, %v132_v13 }
  0x97   :  { %v121_v5 = vpop.f32.mrf.mxu0 }
  0x98   :  { %v122_v6 = vadd.f32 %v121_v5, %v99_v4 }
  0x9a   :  { %v125_v7 = vsel %vm124_vm1, %v122_v6, 0.0 }
  0x9b   :  { %126 = vadd.xlane.f32.xlu0 %v125_v7 }
 0x10e   :  { %v127_v15 = vpop.xlane.xlu0 %126 }
 0x10f   :  { %v135_v16 = vmul.f32 %v134_v14, %v127_v15 }
 0x111   :  { %v136_v17 = vsub.f32 %v122_v6, %v135_v16 }
 0x113   :  { %v137_v18 = vmul.f32 %v136_v17, %v136_v17 }
 0x115   :  { %v138_v19 = vsel %vm124_vm1, %v137_v18, 0.0 }
 0x116   :  { %139 = vadd.xlane.f32.xlu0 %v138_v19 }
 0x189   :  { %v140_v25 = vpop.xlane.xlu0 %139 }
 0x18a   :  { %v141_v26 = vmul.f32 %v140_v25, %v134_v14 }
 0x18c   :  { %v142_v27 = vadd.f32 1e-05, %v141_v26 }
 0x18e   :  { %246 = vrsqrt.f32 %v142_v27  ;;  %vm149_vm4 = vweird.f32 %v142_v27 }
 0x194   :  { %v247_v28 = vpop.eup %246 }
 0x195   :  { %v144_v29 = vmul.f32 %v247_v28, %v142_v27  ;;  %vm150_vm3 = vweird.f32 %v247_v28 }
 0x196   :  { %vm151_vm5 = vmor %vm149_vm4, %vm150_vm3 }
 0x197   :  { %v145_v30 = vmul.f32 %v247_v28, %v144_v29 }
 0x199   :  { %v146_v31 = vmul.f32 0.5, %v145_v30 }
 0x19b   :  { %v147_v32 = vsub.f32 1.5, %v146_v31 }
 0x19d   :  { %v148_v33 = vmul.f32 %v247_v28, %v147_v32 }
 0x19f   :  { %v152_v34 = vsel %vm151_vm5, %v247_v28, %v148_v33 }
 0x1a0   :  { %v153_v35 = vmul.f32 %v152_v34, %v136_v17 }
 0x1a2   :  { %233 = vmatmul.msk.f32.vlgmr.msra.gmra.mxu1 %vm124_vm1, %v153_v35 }
 0x21f   :  { %v179_v40 = vpop.f32.mrf.mxu1 }
 0x220   :  { %v180_v41 = vadd.f32 %v179_v40, %v158_v39 }
 0x222   :  { %v182_v42 = vmax.f32 %v180_v41, 0.0 }
 0x224   :  { %234 = vmatmul.msk.f32.vlgmr.msra.gmra.mxu2 %vm124_vm1, %v182_v42 }
 0x2a7   :  { %v208_v44 = vpop.f32.mrf.mxu2 }
 0x2a8   :  { %v209_v45 = vadd.f32 %v208_v44, %v187_v43 }
 0x2aa   :  { %248 = vtanh.f32 %v209_v45 }
 0x2b0   :  { %v249_v46 = vpop.eup %248 }
 0x2b1   :  { %212 = vst [vmem:[#allocation11] sm:$0xff] %v249_v46 }
 0x2b2   :  { %223 = dma.vmem_to_hbm [thread:$0]  %s219_s4, 128, %s221_s19, [#allocation4]  }
 0x2b3   :  { %400 = dma.done.wait [#allocation4], 128  }
 0x2b4   :  { %401 = vsyncadd [#allocation4], 4294967168 }
 0x2b5   :  { %228 = vsyncpa [#allocation3], 1 }
 0x2b6   :  { %229 = vsyncpa [#allocation6], 1 }
 0x2b7   :  { %230 = vsyncpa [#allocation9], 1 }
 0x2b8   :  { %231 = vsyncpa [#allocation4], 1 }

</bundles_post_ra>
